<compile_context>
chip_gen: v7x
topology: tpu7x:2x2x1
jax: 0.10.0
libtpu: 0.0.40
codegen_flags: <defaults>
</compile_context>

<pallas_src>
import jax
import jax.numpy as jnp
from jax.experimental import pallas as pl
from jax.experimental.pallas import tpu as pltpu


def _round_up(x: int, m: int) -> int:
    return ((x + m - 1) // m) * m


def corr2d_kernel(w_ref, b_ref, x_cur_ref, x_halo_ref, out_ref, xbuf_ref):
    """One TM-row output tile of out[i, j] = sum_{di,dj} w[di,dj]*x[i+di, j+dj] + b.

    x_cur_ref : (TM, W_pad)        rows [i*TM, (i+1)*TM) of the padded input.
    x_halo_ref: (HALO, W_pad)      rows [(i+1)*TM, (i+1)*TM + HALO) (bottom-tap halo).
    xbuf_ref  : (TM+HALO, W_pad)   f32 staging scratch (persistent VMEM).
    """
    kh, kw = w_ref.shape
    tm, w_pad = out_ref.shape
    halo = x_halo_ref.shape[0]
    rows = tm + halo

    # Stage current tile + 8-row halo contiguously; cast exactly once.
    # Both stores are sublane-aligned (tm % 8 == 0); this is the only
    # materialized combined buffer per grid step.
    xbuf_ref[pl.ds(0, tm), :] = x_cur_ref[...].astype(jnp.float32)
    xbuf_ref[pl.ds(tm, halo), :] = x_halo_ref[...].astype(jnp.float32)
    xv = xbuf_ref[...]

    # Bias folded into the accumulator init: one broadcast, outside all loops.
    acc = jnp.full((tm, w_pad), b_ref[0], dtype=jnp.float32)

    for di in range(kh):            # static unroll: kernel size is a compile-time const
        if di == 0:
            xr = xv[:tm, :]                               # aligned prefix slice
        else:
            # Sublane rotate (XLU) of the (tm+halo)-row buffer, then an aligned
            # [:tm] slice: xr[r] = xv[r + di]. No wrap for r < tm since di <= halo.
            xr = pltpu.roll(xv, (rows - di) % rows, axis=0)[:tm, :]
        for dj in range(kw):
            if dj == 0:
                xc = xr
            else:
                # Lane rotate (XLU): xc[:, c] = xr[:, c + dj] for all valid columns.
                xc = pltpu.roll(xr, (w_pad - dj) % w_pad, axis=1)
            acc = acc + w_ref[di, dj] * xc                # SMEM scalar * VPU FMA

    out_ref[...] = acc.astype(out_ref.dtype)              # lane-dense, unmasked vst


def _vmem_limit_bytes(tm, halo, w_pad, in_itemsize, out_itemsize):
    # Live-VMEM estimate: double-buffered cur/halo/out blocks + f32 staging scratch
    # + ~4 f32-tile temporaries (rolled copies + accumulator).
    need = (2 * tm * in_itemsize + 2 * halo * in_itemsize + 2 * tm * out_itemsize
            + (tm + halo) * 4 + 4 * tm * 4) * w_pad + (4 << 20)
    cap = 128 << 20
    try:
        # 64 MiB per TC on v7x, 128 MiB on v5e/v6e.
        cap = int(pltpu.get_tpu_info().vmem_capacity_bytes)
    except Exception:
        pass
    return int(min(max(need, 16 << 20), (cap * 3) // 4))   # leave ~25% headroom


def conv2d_forward(x, weight, bias, *, row_tile=None):
    """Pallas equivalent of Conv2D.forward: corr2d(x, weight) + bias."""
    h, w = x.shape
    kh, kw = weight.shape
    oh, ow = h - kh + 1, w - kw + 1
    assert oh > 0 and ow > 0

    # Lane-dense width; 8-row-aligned halo that covers all bottom kernel taps.
    w_pad = _round_up(w, 128)
    halo = max(8, _round_up(kh - 1, 8))
    assert kh - 1 <= halo, "halo must cover the bottom kernel taps"
    # Lane rolls wrap columns >= w_pad - dj; safe only because valid output columns
    # never read past column w-1 <= w_pad-1.
    assert ow <= w_pad - (kw - 1), "width padding rule violated (lane-roll wrap)"

    # Byte-sized row tile (~1 MiB of f32 output per block), multiple of the halo
    # size, capped so the "parallel" row axis has >= 2 blocks whenever possible.
    if row_tile is None:
        row_tile = (1 << 20) // (w_pad * 4)
    tm = min(_round_up(max(int(row_tile), halo), halo), 1024)
    tm = max(halo, min(tm, _round_up(pl.cdiv(oh, 2), halo)))

    nblk = pl.cdiv(oh, tm)            # grid steps over output row tiles
    oh_pad = nblk * tm
    h_slab = oh_pad + halo            # last current block + its halo stay in bounds

    # Zero-pad input to an aligned slab; valid outputs never read the pad region.
    if (h_slab, w_pad) == (h, w):
        x_slab = x
    else:
        x_slab = jnp.zeros((h_slab, w_pad), x.dtype).at[:h, :w].set(x)

    halo_blocks = tm // halo          # halo block-index stride per grid step

    out_padded = pl.pallas_call(
        corr2d_kernel,
        out_shape=jax.ShapeDtypeStruct((oh_pad, w_pad), x.dtype),
        grid=(nblk,),
        in_specs=[
            pl.BlockSpec(memory_space=pltpu.MemorySpace.SMEM),      # weight (kh, kw)
            pl.BlockSpec(memory_space=pltpu.MemorySpace.SMEM),      # bias (1,)
            pl.BlockSpec((tm, w_pad), lambda i: (i, 0)),            # current row tile
            pl.BlockSpec((halo, w_pad),                             # 8-row halo tile
                         lambda i: ((i + 1) * halo_blocks, 0)),
        ],
        out_specs=pl.BlockSpec((tm, w_pad), lambda i: (i, 0)),
        scratch_shapes=[pltpu.VMEM((tm + halo, w_pad), jnp.float32)],
        compiler_params=pltpu.CompilerParams(
            dimension_semantics=("parallel",),     # independent row tiles (v7x 2 TCs)
            vmem_limit_bytes=_vmem_limit_bytes(
                tm, halo, w_pad, x.dtype.itemsize, x.dtype.itemsize),
        ),
    )(weight, bias, x_slab, x_slab)

    return out_padded[:oh, :ow]


def corr2d_ref(x, weight, bias):
    """Pure-JAX reference of the PyTorch forward, for verification."""
    h, w = x.shape
    kh, kw = weight.shape
    oh, ow = h - kh + 1, w - kw + 1
    out = jnp.full((oh, ow), bias[0], x.dtype)
    for di in range(kh):
        for dj in range(kw):
            out = out + weight[di, dj] * x[di:di + oh, dj:dj + ow]
    return out


if __name__ == "__main__":
    key = jax.random.PRNGKey(0)
    k_x, k_w, k_x2 = jax.random.split(key, 3)

    # Module __init__: weight = torch.rand(kernel_size), bias = torch.zeros(1)
    kernel_size = (3, 3)
    weight = jax.random.uniform(k_w, kernel_size, dtype=jnp.float32)
    bias = jnp.zeros((1,), dtype=jnp.float32)

    # Forward input: a single 2D plane (H, W)
    x = jax.random.normal(k_x, (16, 16), dtype=jnp.float32)
    out = jax.block_until_ready(conv2d_forward(x, weight, bias))
    expected = corr2d_ref(x, weight, bias)
    assert out.shape == (14, 14), out.shape
    assert jnp.allclose(out, expected, atol=1e-4, rtol=1e-4), "mismatch vs reference"

    # Larger plane exercising the multi-step, 8-row-halo row-tiled grid.
    x2 = jax.random.normal(k_x2, (80, 200), dtype=jnp.float32)
    out2 = jax.block_until_ready(conv2d_forward(x2, weight, bias, row_tile=32))
    expected2 = corr2d_ref(x2, weight, bias)
    assert out2.shape == (78, 198), out2.shape
    assert jnp.allclose(out2, expected2, atol=1e-4, rtol=1e-4), "mismatch vs reference (tiled)"

    # Default (bytes-sized) tiling path on the larger plane as well.
    out3 = jax.block_until_ready(conv2d_forward(x2, weight, bias))
    assert jnp.allclose(out3, expected2, atol=1e-4, rtol=1e-4), "mismatch vs reference (default tiling)"

    print("KERNEL_OK")
</pallas_src>

<mosaic_0001>
module attributes {stable_mosaic.version = 11 : i64} {
  func.func @corr2d_kernel(%arg0: i32, %arg1: memref<3x3xf32, #tpu.memory_space<smem>>, %arg2: memref<1xf32, #tpu.memory_space<smem>>, %arg3: memref<8x128xf32, #tpu.memory_space<vmem>>, %arg4: memref<8x128xf32, #tpu.memory_space<vmem>>, %arg5: memref<8x128xf32, #tpu.memory_space<vmem>>, %arg6: memref<16x128xf32, #tpu.memory_space<vmem>>) attributes {dimension_semantics = [#tpu.dimension_semantics<parallel>], iteration_bounds = array<i64: 2>, scalar_prefetch = 0 : i64, scratch_operands = 1 : i64, tpu.core_type = #tpu.core_type<tc>, window_params = [{transform_indices = @transform_0, window_bounds = array<i64: 3, 3>}, {transform_indices = @transform_1, window_bounds = array<i64: 1>}, {transform_indices = @transform_2, window_bounds = array<i64: 8, 128>}, {transform_indices = @transform_3, window_bounds = array<i64: 8, 128>}, {transform_indices = @transform_4, window_bounds = array<i64: 8, 128>}]} {
    %c0 = arith.constant 0 : index
    %c0_0 = arith.constant 0 : index
    %0 = vector.load %arg3[%c0, %c0_0] : memref<8x128xf32, #tpu.memory_space<vmem>>, vector<8x128xf32>
    %c0_1 = arith.constant 0 : index
    %c0_2 = arith.constant 0 : index
    %1 = vector.load %arg6[%c0_1, %c0_2] : memref<16x128xf32, #tpu.memory_space<vmem>>, vector<8x128xf32>
    tpu.vector_store %arg6[%c0_1, %c0_2], %0 {strides = array<i32>} : memref<16x128xf32, #tpu.memory_space<vmem>>, vector<8x128xf32>,
    %c0_3 = arith.constant 0 : index
    %c0_4 = arith.constant 0 : index
    %2 = vector.load %arg4[%c0_3, %c0_4] : memref<8x128xf32, #tpu.memory_space<vmem>>, vector<8x128xf32>
    %c8 = arith.constant 8 : index
    %c0_5 = arith.constant 0 : index
    %3 = vector.load %arg6[%c8, %c0_5] : memref<16x128xf32, #tpu.memory_space<vmem>>, vector<8x128xf32>
    tpu.vector_store %arg6[%c8, %c0_5], %2 {strides = array<i32>} : memref<16x128xf32, #tpu.memory_space<vmem>>, vector<8x128xf32>,
    %c0_6 = arith.constant 0 : index
    %c0_7 = arith.constant 0 : index
    %4 = vector.load %arg6[%c0_6, %c0_7] : memref<16x128xf32, #tpu.memory_space<vmem>>, vector<16x128xf32>
    %c0_8 = arith.constant 0 : index
    %5 = memref.load %arg2[%c0_8] : memref<1xf32, #tpu.memory_space<smem>>
    %6 = vector.broadcast %5 : f32 to vector<8x128xf32>
    %7 = vector.extract_strided_slice %4 {offsets = [0, 0], sizes = [8, 128], strides = [1, 1]} : vector<16x128xf32> to vector<8x128xf32>
    %c0_9 = arith.constant 0 : index
    %c0_10 = arith.constant 0 : index
    %8 = memref.load %arg1[%c0_9, %c0_10] : memref<3x3xf32, #tpu.memory_space<smem>>
    %9 = vector.broadcast %8 : f32 to vector<8x128xf32>
    %10 = arith.mulf %9, %7 : vector<8x128xf32>
    %11 = arith.addf %6, %10 : vector<8x128xf32>
    %c127_i32 = arith.constant 127 : i32
    %12 = tpu.dynamic_rotate %7 by %c127_i32 dim 1 : vector<8x128xf32>, i32 -> vector<8x128xf32>
    %c0_11 = arith.constant 0 : index
    %c1 = arith.constant 1 : index
    %13 = memref.load %arg1[%c0_11, %c1] : memref<3x3xf32, #tpu.memory_space<smem>>
    %14 = vector.broadcast %13 : f32 to vector<8x128xf32>
    %15 = arith.mulf %14, %12 : vector<8x128xf32>
    %16 = arith.addf %11, %15 : vector<8x128xf32>
    %c126_i32 = arith.constant 126 : i32
    %17 = tpu.dynamic_rotate %7 by %c126_i32 dim 1 : vector<8x128xf32>, i32 -> vector<8x128xf32>
    %c0_12 = arith.constant 0 : index
    %c2 = arith.constant 2 : index
    %18 = memref.load %arg1[%c0_12, %c2] : memref<3x3xf32, #tpu.memory_space<smem>>
    %19 = vector.broadcast %18 : f32 to vector<8x128xf32>
    %20 = arith.mulf %19, %17 : vector<8x128xf32>
    %21 = arith.addf %16, %20 : vector<8x128xf32>
    %c15_i32 = arith.constant 15 : i32
    %22 = tpu.dynamic_rotate %4 by %c15_i32 dim 0 : vector<16x128xf32>, i32 -> vector<16x128xf32>
    %23 = vector.extract_strided_slice %22 {offsets = [0, 0], sizes = [8, 128], strides = [1, 1]} : vector<16x128xf32> to vector<8x128xf32>
    %c1_13 = arith.constant 1 : index
    %c0_14 = arith.constant 0 : index
    %24 = memref.load %arg1[%c1_13, %c0_14] : memref<3x3xf32, #tpu.memory_space<smem>>
    %25 = vector.broadcast %24 : f32 to vector<8x128xf32>
    %26 = arith.mulf %25, %23 : vector<8x128xf32>
    %27 = arith.addf %21, %26 : vector<8x128xf32>
    %c127_i32_15 = arith.constant 127 : i32
    %28 = tpu.dynamic_rotate %23 by %c127_i32_15 dim 1 : vector<8x128xf32>, i32 -> vector<8x128xf32>
    %c1_16 = arith.constant 1 : index
    %c1_17 = arith.constant 1 : index
    %29 = memref.load %arg1[%c1_16, %c1_17] : memref<3x3xf32, #tpu.memory_space<smem>>
    %30 = vector.broadcast %29 : f32 to vector<8x128xf32>
    %31 = arith.mulf %30, %28 : vector<8x128xf32>
    %32 = arith.addf %27, %31 : vector<8x128xf32>
    %c126_i32_18 = arith.constant 126 : i32
    %33 = tpu.dynamic_rotate %23 by %c126_i32_18 dim 1 : vector<8x128xf32>, i32 -> vector<8x128xf32>
    %c1_19 = arith.constant 1 : index
    %c2_20 = arith.constant 2 : index
    %34 = memref.load %arg1[%c1_19, %c2_20] : memref<3x3xf32, #tpu.memory_space<smem>>
    %35 = vector.broadcast %34 : f32 to vector<8x128xf32>
    %36 = arith.mulf %35, %33 : vector<8x128xf32>
    %37 = arith.addf %32, %36 : vector<8x128xf32>
    %c14_i32 = arith.constant 14 : i32
    %38 = tpu.dynamic_rotate %4 by %c14_i32 dim 0 : vector<16x128xf32>, i32 -> vector<16x128xf32>
    %39 = vector.extract_strided_slice %38 {offsets = [0, 0], sizes = [8, 128], strides = [1, 1]} : vector<16x128xf32> to vector<8x128xf32>
    %c2_21 = arith.constant 2 : index
    %c0_22 = arith.constant 0 : index
    %40 = memref.load %arg1[%c2_21, %c0_22] : memref<3x3xf32, #tpu.memory_space<smem>>
    %41 = vector.broadcast %40 : f32 to vector<8x128xf32>
    %42 = arith.mulf %41, %39 : vector<8x128xf32>
    %43 = arith.addf %37, %42 : vector<8x128xf32>
    %c127_i32_23 = arith.constant 127 : i32
    %44 = tpu.dynamic_rotate %39 by %c127_i32_23 dim 1 : vector<8x128xf32>, i32 -> vector<8x128xf32>
    %c2_24 = arith.constant 2 : index
    %c1_25 = arith.constant 1 : index
    %45 = memref.load %arg1[%c2_24, %c1_25] : memref<3x3xf32, #tpu.memory_space<smem>>
    %46 = vector.broadcast %45 : f32 to vector<8x128xf32>
    %47 = arith.mulf %46, %44 : vector<8x128xf32>
    %48 = arith.addf %43, %47 : vector<8x128xf32>
    %c126_i32_26 = arith.constant 126 : i32
    %49 = tpu.dynamic_rotate %39 by %c126_i32_26 dim 1 : vector<8x128xf32>, i32 -> vector<8x128xf32>
    %c2_27 = arith.constant 2 : index
    %c2_28 = arith.constant 2 : index
    %50 = memref.load %arg1[%c2_27, %c2_28] : memref<3x3xf32, #tpu.memory_space<smem>>
    %51 = vector.broadcast %50 : f32 to vector<8x128xf32>
    %52 = arith.mulf %51, %49 : vector<8x128xf32>
    %53 = arith.addf %48, %52 : vector<8x128xf32>
    %c0_29 = arith.constant 0 : index
    %c0_30 = arith.constant 0 : index
    %54 = vector.load %arg5[%c0_29, %c0_30] : memref<8x128xf32, #tpu.memory_space<vmem>>, vector<8x128xf32>
    tpu.vector_store %arg5[%c0_29, %c0_30], %53 {strides = array<i32>} : memref<8x128xf32, #tpu.memory_space<vmem>>, vector<8x128xf32>,
    return
  }
  func.func @transform_0(%arg0: i32) -> (i32, i32) {
    %c0_i32 = arith.constant 0 : i32
    %c0_i32_0 = arith.constant 0 : i32
    %c0_i32_1 = arith.constant 0 : i32
    return %c0_i32, %c0_i32_0 : i32, i32
  }
  func.func @transform_1(%arg0: i32) -> i32 {
    %c0_i32 = arith.constant 0 : i32
    %c0_i32_0 = arith.constant 0 : i32
    return %c0_i32 : i32
  }
  func.func @transform_2(%arg0: i32) -> (i32, i32) {
    %c0_i32 = arith.constant 0 : i32
    %c0_i32_0 = arith.constant 0 : i32
    return %arg0, %c0_i32 : i32, i32
  }
  func.func @transform_3(%arg0: i32) -> (i32, i32) {
    %c1_i32 = arith.constant 1 : i32
    %0 = arith.addi %arg0, %c1_i32 : i32
    %c1_i32_0 = arith.constant 1 : i32
    %1 = arith.muli %0, %c1_i32_0 : i32
    %c0_i32 = arith.constant 0 : i32
    %c0_i32_1 = arith.constant 0 : i32
    return %1, %c0_i32 : i32, i32
  }
  func.func @transform_4(%arg0: i32) -> (i32, i32) {
    %c0_i32 = arith.constant 0 : i32
    %c0_i32_0 = arith.constant 0 : i32
    return %arg0, %c0_i32 : i32, i32
  }
}

</mosaic_0001>

<bundles_post_ra>
// kernel: tpu_custom_call.1
= control target key start
LH: loop header
LB: loop body
LE: loop exit
PB: predicated region body
PF: predicated region fallthrough
CT: control target
= control target key end

     0   :  { %s1070_s0 = inlined_call_operand.hbm [shape: f32[3,3], index: 0, kind: input, shape index: {}]   ;;  %s1071_s1 = inlined_call_operand.<no memory space> [shape: f32[1], index: 1, kind: input, shape index: {}]   ;;  %s1072_s2 = inlined_call_operand.hbm [shape: f32[24,128], index: 2, kind: input, shape index: {}]   ;;  %s1073_s3 = inlined_call_operand.hbm [shape: f32[24,128], index: 3, kind: input, shape index: {}]   ;;  %s1074_s4 = inlined_call_operand.hbm [shape: f32[16,128], index: 4, kind: output, shape index: {}]  }
   0x1   :  { %1081 = sst [smem:[#allocation16_spill]] %s1070_s0 }
   0x2   :  { %9 = sst [smem:[#allocation3]] %s1071_s1 }
   0x3   :  { %10 = vsyncpa [#allocation7], 0 }
   0x4   :  { %11 = vsyncpa [#allocation5], 0 }
   0x5   :  { %13 = vsyncpa [#allocation5 + $0x1], 0 }
   0x6   :  { %14 = vsyncpa [#allocation10], 0 }
   0x7   :  { %16 = vsyncpa [#allocation10 + $0x1], 0 }
   0x8   :  { %17 = vsyncpa [#allocation6], 0 }
   0x9   :  { %19 = vsyncpa [#allocation6 + $0x1], 0  ;;  %s775_s17 = smov 0   ;;  %s777_s18 = smov 0  }
   0xa   :  { %s779_s19 = smov 0   ;;  %s781_s20 = smov 0  }
   0xb   :  { %s783_s21 = smov 0   ;;  %s785_s22 = smov 0  }
   0xc   :  { %s787_s1 = smov 0  }
   0xd LB: > { %s809_s23 = sadd.s32 4294967295, %s739_s1   ;;  %s454_s24 = sadd.s32 4294967294, %s739_s1   ;;  %s739_s1 = sphi %s787_s1, %s1108_s1   ;;  %s735_s22 = sphi %s785_s22, %s1107_s22   ;;  %s731_s21 = sphi %s783_s21, %s1106_s21   ;;  %s727_s20 = sphi %s781_s20, %s1105_s20   ;;  %s723_s19 = sphi %s779_s19, %s1104_s19   ;;  %s719_s18 = sphi %s777_s18, %s1103_s18   ;;  %s715_s17 = sphi %s775_s17, %s1102_s17  }
   0xe   : > { %p87_p0 = scmp.ne.s32.totalorder %s731_s21, %s727_s20  ;;  %p1075_p1 = scmp.eq.s32.totalorder %s809_s23, 0 }
   0xf   : > { %p115_p2 = scmp.ne.s32.totalorder %s719_s18, %s715_s17  ;;  %p145_p5 = scmp.eq.s32.totalorder %s454_s24, 1 }
  0x10   : > { %p819_p4 = por %p1075_p1, %p87_p0  ;;  %p455_p7 = scmp.ge.s32.totalorder %s739_s1, 1 }
  0x11   : > { %p825_p6 = por %p115_p2, %p1075_p1  ;;  %p830_p8 = por %p145_p5, %p87_p0 }
  0x12   : > { %s1082_s25 = scalar_select %p819_p4, 1, 0 }
  0x13   : > { %s1083_s26 = scalar_select %p825_p6, 1, 0 }
  0x14   : > { %s1084_s27 = scalar_select %p830_p8, 1, 0 }
  0x15   : > { %p152_p9 = scmp.lt.s32.totalorder %s739_s1, 3  ;;  %s841_s29 = sadd.s32 1, %s739_s1  }
  0x16   : > { %s71_s30 = ssub.s32 %s739_s1, %s841_s29  ;;  %s74_s5 = sadd.s32 1, %s735_s22 }
  0x17   : > { %p835_p10 = pnand %p455_p7, %p152_p9  ;;  %p854_p0 = scmp.eq.s32.totalorder %s71_s30, 0 }
  0x18   : > { %p81_p2 = scmp.ne.s32.totalorder %s735_s22, %s731_s21  ;;  %p1077_p5 = scmp.eq.s32.totalorder %s739_s1, 0 }
  0x19   : > { %p489_p12 = pneg %p835_p10  ;;  %p1076_p7 = scmp.lt.s32.totalorder %s739_s1, 2 }
  0x1a   : > { %s1088_s0 = sld [smem:[#allocation16_spill]] }
  0x1b   : > { %p850_p13 = pnand %p489_p12, %p1075_p1 }
  0x1d   : > { %p569_p12 = pneg %p850_p13 }
  0x20   : > { %s567_s10 = scalar_lea.hbm %s1088_s0, 64 }
  0x21   : > { %p568_p9 = scmp.ne.s32.totalorder %s1088_s0, %s567_s10  ;;  %p574_p3 = scmp.lt.u32.totalorder %s567_s10, %s1088_s0 }
  0x23   : > { %p570_p11 = pnand %p569_p12, %p568_p9 }
  0x25   : > { %p571_p1 = pneg %p570_p11 }
  0x27   : > { %p576_p8 = pnand %p574_p3, %p571_p1 }
  0x29   : > { %579 = shalt.err (!%p576_p8)
}
  0x2a   : > { %s741_s15 = smov [#allocation4]   ;;  %p83_p1 = por %p1077_p5, %p81_p2 }
  0x2b   : > { %492 = dma.hbm_to_smem (!%p850_p13), %s1088_s0, 64, %s741_s15, [#allocation7]  }
  0x2c   : > { %s881_s24 = scalar_select %p854_p0, %s735_s22, %s74_s5  }
  0x2d   : > { %p1089_p3 = scmp.eq.s32.totalorder %s809_s23, 1  ;;  %s177_s6 = sand.u32 1, %s735_s22  }
  0x2e   : > { %s459_s8 = sshll.u32 %s739_s1, 7  ;;  %s458_s9 = sshll.u32 %s177_s6, 3 }
  0x2f   : > { %p893_p8 = por %p1089_p3, %p81_p2  ;;  %s904_s12 = scalar_lea.hbm %s1072_s2, %s459_s8 }
  0x30   : > { %s181_s5 = scalar_lea.vmem [#allocation8], %s458_s9  ;;  %p908_p11 = pnand %p1076_p7, %p83_p1 }
  0x31   : > { %s1090_s30 = scalar_select %p893_p8, 1, 0 }
  0x32   : > { %s188_s7 = sshll.u32 %s181_s5, 4  ;;  %s178_s14 = scalar_lea.sflag [#allocation5], %s177_s6  ;;  %s912_s7 = int_to_ptr.vmem [resolvable:$true] %s188_s7 }
  0x33   : > { %s580_s15 = scalar_lea.hbm %s904_s12, 128  ;;  %p582_p0 = pneg %p908_p11 }
  0x34   : > { %p581_p13 = scmp.ne.s32.totalorder %s904_s12, %s580_s15  ;;  %s585_s9 = scalar_lea.hbm %s1072_s2, 384 }
  0x35   : > { %p586_p12 = scmp.lt.u32.totalorder %s904_s12, %s1072_s2  ;;  %p587_p1 = scmp.lt.u32.totalorder %s585_s9, %s580_s15 }
  0x36   : > { %p583_p2 = pnand %p582_p0, %p581_p13  ;;  %p589_p7 = scmp.lt.u32.totalorder %s580_s15, %s904_s12 }
  0x37   : > { %p588_p3 = por %p587_p1, %p586_p12 }
  0x38   : > { %p584_p9 = pneg %p583_p2 }
  0x39   : > { %p590_p5 = por %p589_p7, %p588_p3 }
  0x3b   : > { %p591_p8 = pnand %p590_p5, %p584_p9 }
  0x3d   : > { %594 = shalt.err (!%p591_p8)
}
  0x3e   : > { %s595_s6 = scalar_lea.vmem %s912_s7, 128  ;;  %s742_s5 = smov [#allocation8]  }
  0x3f   : > { %p596_p13 = scmp.ne.s32.totalorder %s912_s7, %s595_s6  ;;  %s600_s16 = sshll.u32 %s742_s5, 4  ;;  %s601_s16 = int_to_ptr.vmem [resolvable:$false] %s600_s16 }
  0x40   : > { %s602_s17 = scalar_lea.vmem %s601_s16, 256  ;;  %p603_p4 = scmp.lt.s32.totalorder %s912_s7, %s601_s16 }
  0x41   : > { %p598_p2 = pnand %p596_p13, %p582_p0  ;;  %p604_p12 = scmp.lt.s32.totalorder %s602_s17, %s595_s6 }
  0x43   : > { %p599_p6 = pneg %p598_p2  ;;  %p605_p1 = por %p604_p12, %p603_p4 }
  0x45   : > { %p606_p7 = pnand %p605_p1, %p599_p6 }
  0x47   : > { %609 = shalt.err (!%p606_p7)
}
  0x48   : > { %496 = dma.hbm_to_vmem [thread:$0]  (!%p908_p11), %s904_s12, 128, %s912_s7, %s178_s14  }
  0x49   : > { %s98_s15 = sadd.s32 1, %s841_s29  ;;  %s102_s9 = sadd.s32 1, %s723_s19 }
  0x4a   : > { %s99_s10 = ssub.s32 %s841_s29, %s98_s15  ;;  %p109_p4 = scmp.ne.s32.totalorder %s723_s19, %s719_s18 }
  0x4b   : > { %p100_p6 = scmp.eq.s32.totalorder %s99_s10, 0  ;;  %s195_s11 = sand.u32 1, %s723_s19  }
  0x4c   : > { %p1092_p5 = scmp.eq.s32.totalorder %s739_s1, 0  ;;  %s460_s6 = sshll.u32 %s195_s11, 3 }
  0x4d   : > { %s948_s13 = scalar_select %p100_p6, %s723_s19, %s102_s9  }
  0x4e   : > { %p111_p8 = por %p109_p4, %p1092_p5  ;;  %s387_s17 = scalar_lea.hbm %s1073_s3, %s459_s8 }
  0x4f   : > { %s955_s0 = scalar_lea.hbm %s387_s17, 128  ;;  %s199_s12 = scalar_lea.vmem [#allocation9], %s460_s6 }
  0x50   : > { %s207_s7 = sshll.u32 %s199_s12, 4  ;;  %p1093_p11 = scmp.lt.s32.totalorder %s739_s1, 2  ;;  %s963_s7 = int_to_ptr.vmem [resolvable:$true] %s207_s7 }
  0x51   : > { %s196_s15 = scalar_lea.sflag [#allocation10], %s195_s11  ;;  %s640_s9 = scalar_lea.hbm %s387_s17, 256 }
  0x52   : > { %p959_p0 = pnand %p1093_p11, %p111_p8  ;;  %p611_p9 = scmp.ne.s32.totalorder %s955_s0, %s640_s9 }
  0x53   : > { %s615_s6 = scalar_lea.hbm %s1073_s3, 384  ;;  %p616_p12 = scmp.lt.u32.totalorder %s955_s0, %s1073_s3 }
  0x54   : > { %p612_p3 = pneg %p959_p0  ;;  %p617_p1 = scmp.lt.u32.totalorder %s615_s6, %s640_s9 }
  0x55   : > { %p619_p4 = scmp.lt.u32.totalorder %s640_s9, %s955_s0 }
  0x56   : > { %p613_p13 = pnand %p612_p3, %p611_p9  ;;  %p618_p7 = por %p617_p1, %p616_p12 }
  0x58   : > { %p614_p2 = pneg %p613_p13  ;;  %p620_p6 = por %p619_p4, %p618_p7 }
  0x5a   : > { %p621_p5 = pnand %p620_p6, %p614_p2 }
  0x5c   : > { %624 = shalt.err (!%p621_p5)
}
  0x5d   : > { %s625_s11 = scalar_lea.vmem %s963_s7, 128  ;;  %s743_s17 = smov [#allocation9]  }
  0x5e   : > { %p626_p8 = scmp.ne.s32.totalorder %s963_s7, %s625_s11  ;;  %s630_s12 = sshll.u32 %s743_s17, 4  ;;  %s631_s12 = int_to_ptr.vmem [resolvable:$false] %s630_s12 }
  0x5f   : > { %s632_s8 = scalar_lea.vmem %s631_s12, 256  ;;  %p633_p13 = scmp.lt.s32.totalorder %s963_s7, %s631_s12 }
  0x60   : > { %p628_p11 = pnand %p626_p8, %p612_p3  ;;  %p634_p12 = scmp.lt.s32.totalorder %s632_s8, %s625_s11 }
  0x62   : > { %p629_p9 = pneg %p628_p11  ;;  %p635_p1 = por %p634_p12, %p633_p13 }
  0x64   : > { %p636_p7 = pnand %p635_p1, %p629_p9 }
  0x66   : > { %639 = shalt.err (!%p636_p7)
}
  0x67   : > { %499 = dma.hbm_to_vmem [thread:$0]  (!%p959_p0), %s955_s0, 128, %s963_s7, %s196_s15  }
  0x68   : > { %216 = sbr.rel (%p835_p10) target bundleno = 272 (0x110), region = 36  ;;  %p1095_p3 = scmp.eq.s32.totalorder (!%p835_p10), %s809_s23, 0 }
  0x6f   : > { %698 = dma.done.wait (%p1095_p3), [#allocation7], 64   ;;  %p1096_p2 = pmov %p1095_p3 }
  0x70   : > { %s996_s9 = sand.u32 1, %s731_s21   ;;  %p1097_p0 = scmp.ne.s32.totalorder %s1082_s25, 0 }
  0x71   : > { %700 = vsyncadd (%p1096_p2), [#allocation7], 4294967232  ;;  %s464_s14 = sshll.u32 %s996_s9, 3  ;;  %s223_s10 = scalar_lea.sflag [#allocation5], %s996_s9 }
  0x72   : > { %s226_s0 = scalar_lea.vmem [#allocation8], %s464_s14 }
  0x73   : > { %702 = dma.done.wait (%p1097_p0), %s223_s10, 128  }
  0x74   : > { %704 = vsyncadd (%p1097_p0), %s223_s10, 4294967168  ;;  %s231_s28 = sand.u32 1, %s719_s18   ;;  %p1098_p10 = scmp.ne.s32.totalorder %s1083_s26, 0 }
  0x75   : > { %s465_s7 = sshll.u32 %s231_s28, 3  ;;  %s232_s15 = scalar_lea.sflag [#allocation10], %s231_s28 }
  0x76   : > { %s235_s6 = scalar_lea.vmem [#allocation9], %s465_s7 }
  0x77   : > { %706 = dma.done.wait (%p1098_p10), %s232_s15, 128  }
  0x78   : > { %708 = vsyncadd (%p1098_p10), %s232_s15, 4294967168 }
  0x79   : > { %240 = sfence }
  0x7a   : > { %v267_v0 = vld [vmem:[%s226_s0] sm:$0xff]  ;;  %v269_v1 = vld [vmem:[%s235_s6] sm:$0xff]  ;;  %v293_v2 = vlaneseq  ;;  %s744_s5 = smov 127   ;;  %s745_s25 = smov 126  }
  0x7b   : > { %279 = vrot.lane.b32.xlu0 %v267_v0, %s744_s5  ;;  %v291_v3 = vrot.slane %v267_v0, 1  ;;  %v292_v4 = vrot.slane %v269_v1, 1  ;;  %v313_v6 = vrot.slane %v267_v0, 2  ;;  %v314_v7 = vrot.slane %v269_v1, 2  ;;  %s275_s26 = sld [smem:[#allocation4]]  ;;  %s273_s16 = sld [smem:[#allocation3]] }
  0x7c   : > { %v294_v5 = vshrl.u32 %v293_v2, 7  ;;  %s467_s11 = sld [smem:[#allocation4 + $0x1]]  ;;  %s469_s17 = sld [smem:[#allocation4 + $0x80]] }
  0x7d   : > { %s468_s12 = sld [smem:[#allocation4 + $0x2]]  ;;  %s470_s8 = sld [smem:[#allocation4 + $0x81]] }
  0x7e   : > { %vm295_vm0 = vcmp.lt.s32.totalorder %v294_v5, 7  ;;  %vm315_vm1 = vcmp.lt.s32.totalorder %v294_v5, 6  ;;  %s471_s10 = sld [smem:[#allocation4 + $0x82]]  ;;  %s472_s0 = sld [smem:[#allocation4 + $0x100]] }
  0x7f   : > { %285 = vrot.lane.b32.xlu0 %v267_v0, %s745_s25  ;;  %v296_v8 = vsel %vm295_vm0, %v291_v3, %v292_v4  ;;  %v316_v9 = vsel %vm315_vm1, %v313_v6, %v314_v7  ;;  %s473_s28 = sld [smem:[#allocation4 + $0x101]]  ;;  %s474_s7 = sld [smem:[#allocation4 + $0x102]] }
  0x80   : > { %301 = vrot.lane.b32.xlu1 %v296_v8, %s744_s5  ;;  %s476_s15 = sshll.u32 %s809_s23, 7  ;;  %s265_s6 = scalar_lea.vmem [#allocation11], %s464_s14 }
  0x81   : > { %v276_v10 = vstv %s275_s26  ;;  %v274_v12 = vstv %s273_s16  ;;  %s1017_s16 = scalar_lea.hbm %s1074_s4, %s476_s15  ;;  %p1099_p6 = scmp.ne.s32.totalorder %s1090_s30, 0 }
  0x82   : > { %v277_v11 = vmul.f32 %v276_v10, %v267_v0  ;;  %v282_v13 = vstv %s467_s11  ;;  %v298_v17 = vstv %s469_s17  ;;  %s335_s11 = scalar_lea.sflag [#allocation6], %s996_s9  ;;  %s746_s23 = smov [#allocation11]  }
  0x83   : > { %321 = vrot.lane.b32.xlu0 %v316_v9, %s744_s5  ;;  %v288_v18 = vstv %s468_s12  ;;  %v299_v20 = vmul.f32 %v298_v17, %v296_v8  ;;  %v304_v24 = vstv %s470_s8  ;;  %s348_s5 = sshll.u32 %s265_s6, 4  ;;  %s645_s14 = sshll.u32 %s746_s23, 4  ;;  %s1019_s5 = int_to_ptr.vmem [resolvable:$true] %s348_s5  ;;  %s646_s14 = int_to_ptr.vmem [resolvable:$false] %s645_s14 }
  0x84   : > { %307 = vrot.lane.b32.xlu1 %v296_v8, %s745_s25  ;;  %v278_v15 = vadd.f32 %v277_v11, %v274_v12  ;;  %v310_v26 = vstv %s471_s10  ;;  %v318_v27 = vstv %s472_s0  ;;  %s641_s17 = scalar_lea.vmem %s1019_s5, 128  ;;  %s647_s12 = scalar_lea.vmem %s646_s14, 256 }
  0x85   : > { %v324_v32 = vstv %s473_s28  ;;  %v319_v34 = vmul.f32 %v318_v27, %v316_v9  ;;  %v330_v36 = vstv %s474_s7  ;;  %p642_p4 = scmp.ne.s32.totalorder %s1019_s5, %s641_s17  ;;  %p648_p11 = scmp.lt.s32.totalorder %s1019_s5, %s646_s14 }
  0x86   : > { %p649_p9 = scmp.lt.s32.totalorder %s647_s12, %s641_s17 }
  0x87   : > { %p643_p5 = pnand %p642_p4, %p1099_p6 }
  0x88   : > { %327 = vrot.lane.b32.xlu1 %v316_v9, %s745_s25  ;;  %p650_p13 = por %p649_p9, %p648_p11 }
  0x89   : > { %p644_p8 = pneg %p643_p5 }
  0x8b   : > { %p651_p12 = pnand %p650_p13, %p644_p8 }
  0xed   : > { %v280_v14 = vpop.permute.xlu0 %279 }
  0xee   : > { %v283_v16 = vmul.f32 %v282_v13, %v280_v14 }
  0xf0   : > { %v284_v21 = vadd.f32 %v283_v16, %v278_v15 }
  0xf1   : > { %v286_v19 = vpop.permute.xlu0 %285 }
  0xf2   : > { %v289_v22 = vmul.f32 %v288_v18, %v286_v19  ;;  %v302_v23 = vpop.permute.xlu1 %301 }
  0xf3   : > { %v305_v29 = vmul.f32 %v304_v24, %v302_v23 }
  0xf4   : > { %v290_v25 = vadd.f32 %v289_v22, %v284_v21 }
  0xf5   : > { %v322_v33 = vpop.permute.xlu0 %321 }
  0xf6   : > { %v300_v28 = vadd.f32 %v299_v20, %v290_v25  ;;  %v308_v30 = vpop.permute.xlu1 %307  ;;  %v325_v38 = vmul.f32 %v324_v32, %v322_v33 }
  0xf7   : > { %v311_v31 = vmul.f32 %v310_v26, %v308_v30 }
  0xf8   : > { %v306_v35 = vadd.f32 %v305_v29, %v300_v28 }
  0xfa   : > { %v312_v37 = vadd.f32 %v311_v31, %v306_v35  ;;  %v328_v39 = vpop.permute.xlu1 %327 }
  0xfb   : > { %v331_v41 = vmul.f32 %v330_v36, %v328_v39 }
  0xfc   : > { %v320_v40 = vadd.f32 %v319_v34, %v312_v37 }
  0xfe   : > { %v326_v42 = vadd.f32 %v325_v38, %v320_v40 }
 0x100   : > { %v332_v43 = vadd.f32 %v331_v41, %v326_v42 }
 0x102   : > { %333 = vst [vmem:[%s265_s6] sm:$0xff] %v332_v43 }
 0x103   : > { %654 = shalt.err (!%p651_p12)
}
 0x104   : > { %s655_s9 = scalar_lea.hbm %s1017_s16, 128  ;;  %s659_s0 = scalar_lea.hbm %s1074_s4, 256 }
 0x105   : > { %p656_p1 = scmp.ne.s32.totalorder %s1017_s16, %s655_s9  ;;  %p660_p2 = scmp.lt.u32.totalorder %s1017_s16, %s1074_s4 }
 0x106   : > { %p661_p0 = scmp.lt.u32.totalorder %s659_s0, %s655_s9  ;;  %p663_p4 = scmp.lt.u32.totalorder %s655_s9, %s1017_s16 }
 0x107   : > { %p657_p7 = pnand %p656_p1, %p1099_p6 }
 0x108   : > { %p662_p10 = por %p661_p0, %p660_p2 }
 0x109   : > { %p658_p3 = pneg %p657_p7 }
 0x10a   : > { %p664_p5 = por %p663_p4, %p662_p10 }
 0x10c   : > { %p665_p8 = pnand %p664_p5, %p658_p3 }
 0x10e   : > { %668 = shalt.err (!%p665_p8)
}
 0x10f   : > { %487 = dma.vmem_to_hbm [thread:$0]  (%p1099_p6), %s1019_s5, 128, %s1017_s16, %s335_s11  }
 0x110 PF: > { %s360_s15 = sand.u32 1, %s727_s20   ;;  %p1100_p11 = scmp.ne.s32.totalorder %s1084_s27, 0 }
 0x111   : > { %p1101_p9 = scmp.ge.s32.totalorder %s739_s1, 2  ;;  %s361_s6 = scalar_lea.sflag [#allocation6], %s360_s15 }
 0x113   : > { %p501_p13 = pnand %p1101_p9, %p1100_p11 }
 0x115   : > { %710 = dma.done.wait (!%p501_p13), %s361_s6, 128  }
 0x116   : > { %712 = vsyncadd (!%p501_p13), %s361_s6, 4294967168  ;;  %p22_p6 = scmp.ge.s32.totalorder %s841_s29, 4   ;;  %s1102_s17 = smov %s719_s18 }
 0x117   : > { %s1103_s18 = smov %s723_s19  ;;  %s1104_s19 = smov %s948_s13 }
 0x118   : > { %s1105_s20 = smov %s731_s21  ;;  %s1106_s21 = smov %s735_s22 }
 0x119   : > { %s1107_s22 = smov %s881_s24  ;;  %s1108_s1 = smov %s841_s29 }
 0x11a   :  { %24 = sbr.rel (!%p22_p6) target bundleno = 13 (0xd), region = 99 }
 0x121   :  { %366 = vsyncpa [#allocation5], 1 }
 0x122   :  { %368 = vsyncpa [#allocation5 + $0x1], 1 }
 0x123   :  { %369 = vsyncpa [#allocation10], 1 }
 0x124   :  { %371 = vsyncpa [#allocation10 + $0x1], 1 }
 0x125   :  { %372 = vsyncpa [#allocation6], 1 }
 0x126   :  { %374 = vsyncpa [#allocation6 + $0x1], 1 }
 0x127   :  { %375 = vsyncpa [#allocation7], 1 }
 0x128   :  { %377 = vsyncpa [#allocation7 + $0x1], 1 }

</bundles_post_ra>
